<compile_context>
chip_gen: v7x
topology: tpu7x:2x2x1
jax: 0.10.0
libtpu: 0.0.40
codegen_flags: <defaults>
</compile_context>

<pallas_src>
import jax
import jax.numpy as jnp
import numpy as np
from jax.experimental import pallas as pl
from jax.experimental.pallas import tpu as pltpu


def _round_up(x, m):
    return ((x + m - 1) // m) * m


def _largest_divisor_tile(total, max_tile, align=128):
    """Largest multiple of `align` that divides `total` and is <= max_tile."""
    if total <= align:
        return total
    best = align
    t = align
    while t <= min(max_tile, total):
        if total % t == 0:
            best = t
        t += align
    return best


# ---------------------------------------------------------------------------
# One-time parameter preparation (hoisted out of the forward path).
# ---------------------------------------------------------------------------
def prepare_params(params):
    """Pad + bf16-cast all weights once at init.

    Invariants the kernels rely on:
      * padded columns/rows of every weight and bias are exactly zero;
      * w_fc is stored (Rp*H, Fp) with zero rows for r in [R, Rp), so `hidden`
        can keep its Rp padding through the flatten;
      * padded fc output columns are therefore exactly zero, so the padded
        task-head weight rows never contribute.
    """
    w_s1, b_s1 = params["w_s1"], params["b_s1"]
    w_s2, b_s2 = params["w_s2"], params["b_s2"]
    w_fc, b_fc = params["w_fc"], params["b_fc"]

    H, DA = w_s1.shape
    R = w_s2.shape[1]
    K, F = w_fc.shape
    assert K == R * H

    DAp = _round_up(DA, 128)
    Rp = _round_up(R, 8)
    Fp = _round_up(F, 128)

    arrays = {
        "w_s1": jnp.pad(w_s1, ((0, 0), (0, DAp - DA))).astype(jnp.bfloat16),
        "b_s1": jnp.pad(b_s1, ((0, 0), (0, DAp - DA))).astype(jnp.float32),
        "w_s2": jnp.pad(w_s2, ((0, DAp - DA), (0, Rp - R))).astype(jnp.bfloat16),
        "b_s2": jnp.pad(b_s2, ((0, 0), (0, Rp - R))).astype(jnp.float32),
        # (R*H, F) -> (R, H, F) -> pad R->Rp, F->Fp -> (Rp*H, Fp); padded rows/cols zero.
        "w_fc": jnp.pad(
            w_fc.reshape(R, H, F), ((0, Rp - R), (0, 0), (0, Fp - F))
        ).reshape(Rp * H, Fp).astype(jnp.bfloat16),
        "b_fc": jnp.pad(b_fc, ((0, 0), (0, Fp - F))).astype(jnp.float32),
    }
    dims = {"H": H, "DA": DA, "R": R, "F": F, "DAp": DAp, "Rp": Rp, "Fp": Fp}

    for name in ("ocemo", "ocnli", "tnews"):
        w_t, b_t = params[f"w_{name}"], params[f"b_{name}"]
        C = w_t.shape[1]
        Cp = _round_up(C, 128)
        arrays[f"w_{name}"] = jnp.pad(
            w_t, ((0, Fp - F), (0, Cp - C))).astype(jnp.bfloat16)
        arrays[f"b_{name}"] = jnp.pad(b_t, ((0, 0), (0, Cp - C))).astype(jnp.float32)
        dims[f"C_{name}"] = C

    return arrays, dims


# ---------------------------------------------------------------------------
# Kernel 1: structured self-attention head (Bt batch rows per grid step)
#   a      = tanh(embs @ W_s1 + b_s1) @ W_s2 + b_s2          # (Bt, S, Rp)
#   attn   = softmax over S (no transpose needed)            # (Bt, S, Rp)
#   hidden = attn^T @ embs  (batched, contract S)            # (Bt, Rp, H)  bf16 out
# ---------------------------------------------------------------------------
def _self_att_kernel(embs_ref, ws1_ref, bs1_ref, ws2_ref, bs2_ref, out_ref):
    e = embs_ref[...]                                   # (Bt, S, H) bf16
    Bt, S, H = e.shape
    Rp = ws2_ref.shape[1]

    e2 = e.reshape(Bt * S, H)
    # bf16 MXU operands, f32 accumulation; tanh/exp stay f32 (v5e-safe).
    s1 = jnp.tanh(
        jnp.dot(e2, ws1_ref[...], preferred_element_type=jnp.float32)
        + bs1_ref[...]                                   # (Bt*S, DAp) f32
    )
    a = (
        jnp.dot(s1.astype(jnp.bfloat16), ws2_ref[...],
                preferred_element_type=jnp.float32)
        + bs2_ref[...]                                   # (Bt*S, Rp) f32
    ).reshape(Bt, S, Rp)

    # Softmax over the sequence axis S (axis=1) — equals torch's softmax(dim=2)
    # after permute(0,2,1), without the XLU transpose.
    m = jnp.max(a, axis=1, keepdims=True)
    p = jnp.exp(a - m)
    denom = jnp.sum(p, axis=1, keepdims=True)
    attn = p * pl.reciprocal(denom, approx=True)         # (Bt, S, Rp) f32

    # hidden[b] = attn[b]^T @ e[b] — single batched bf16 contraction over S.
    hidden = jax.lax.dot_general(
        attn.astype(jnp.bfloat16), e,
        dimension_numbers=(((1,), (1,)), ((0,), (0,))),
        preferred_element_type=jnp.float32,
    )                                                     # (Bt, Rp, H) f32
    out_ref[...] = hidden.astype(out_ref.dtype)


def self_att(embs, w_s1, b_s1, w_s2, b_s2, *, block_b=4):
    B, S, H = embs.shape
    DAp = w_s1.shape[1]
    Rp = w_s2.shape[1]

    # Fallback only — the backbone is expected to already emit bf16 activations.
    if embs.dtype != jnp.bfloat16:
        embs = embs.astype(jnp.bfloat16)

    Bt = min(block_b, B)
    if B >= 2:
        Bt = min(Bt, max(1, B // 2))   # >=2 grid steps so both v7x TCs get work
    Bp = _round_up(B, Bt)
    embs_p = jnp.pad(embs, ((0, Bp - B), (0, 0), (0, 0))) if Bp > B else embs

    hidden = pl.pallas_call(
        _self_att_kernel,
        out_shape=jax.ShapeDtypeStruct((Bp, Rp, H), jnp.bfloat16),
        grid_spec=pltpu.PrefetchScalarGridSpec(
            num_scalar_prefetch=0,
            grid=(Bp // Bt,),
            in_specs=[
                pl.BlockSpec((Bt, S, H), lambda b: (b, 0, 0)),
                pl.BlockSpec((H, DAp), lambda b: (0, 0)),
                pl.BlockSpec((1, DAp), lambda b: (0, 0)),
                pl.BlockSpec((DAp, Rp), lambda b: (0, 0)),
                pl.BlockSpec((1, Rp), lambda b: (0, 0)),
            ],
            out_specs=pl.BlockSpec((Bt, Rp, H), lambda b: (b, 0, 0)),
        ),
        compiler_params=pltpu.CompilerParams(
            dimension_semantics=("parallel",),
            vmem_limit_bytes=32 * 1024 * 1024,
        ),
    )(embs_p, w_s1, b_s1, w_s2, b_s2)
    # Keep the Rp padding (matched by zero rows in the pre-padded w_fc).
    return hidden[:B] if Bp > B else hidden               # (B, Rp, H) bf16


# ---------------------------------------------------------------------------
# Kernel 2: fc matmul  flat (B, Kp) @ w_fc (Kp, Fp) + b_fc — tiled over (N, K),
# bf16 streaming, f32 VMEM accumulator, init/finalize on the K axis.
# ---------------------------------------------------------------------------
def _fc_kernel(flat_ref, wfc_ref, bfc_ref, out_ref, acc_ref):
    @pl.when(pl.program_id(1) == 0)
    def _():
        acc_ref[...] = jnp.zeros_like(acc_ref)

    acc_ref[...] += jnp.dot(flat_ref[...], wfc_ref[...],
                            preferred_element_type=jnp.float32)

    @pl.when(pl.program_id(1) == pl.num_programs(1) - 1)
    def _():
        out_ref[...] = acc_ref[...] + bfc_ref[...]


def fc_layer(flat, w_fc, b_fc, *, max_k_tile=3072, max_n_tile=1024):
    B, K = flat.shape
    Kp, Fp = w_fc.shape
    assert K == Kp, "flat must carry the same Rp padding as the pre-padded w_fc"

    # Exact divisors of the pre-padded dims: no wasted zero-row DMA, fewer grid steps.
    k_tile = _largest_divisor_tile(Kp, max_k_tile)
    n_tile = _largest_divisor_tile(Fp, max_n_tile)

    fc_out = pl.pallas_call(
        _fc_kernel,
        out_shape=jax.ShapeDtypeStruct((B, Fp), jnp.float32),
        grid_spec=pltpu.PrefetchScalarGridSpec(
            num_scalar_prefetch=0,
            grid=(Fp // n_tile, Kp // k_tile),
            in_specs=[
                pl.BlockSpec((B, k_tile), lambda n, k: (0, k)),
                pl.BlockSpec((k_tile, n_tile), lambda n, k: (k, n)),
                pl.BlockSpec((1, n_tile), lambda n, k: (0, n)),
            ],
            out_specs=pl.BlockSpec((B, n_tile), lambda n, k: (0, n)),
            scratch_shapes=[pltpu.VMEM((B, n_tile), jnp.float32)],
        ),
        compiler_params=pltpu.CompilerParams(
            dimension_semantics=("parallel", "arbitrary"),
            vmem_limit_bytes=32 * 1024 * 1024,
        ),
    )(flat, w_fc, b_fc)
    return fc_out  # (B, Fp) f32; padded columns exactly zero


# ---------------------------------------------------------------------------
# Kernel 3: task-specific head (Fp -> Cp), lane-dense output, sliced outside.
# ---------------------------------------------------------------------------
def _task_head_kernel(fc_ref, wt_ref, bt_ref, out_ref):
    out_ref[...] = (
        jnp.dot(fc_ref[...].astype(jnp.bfloat16), wt_ref[...],
                preferred_element_type=jnp.float32)
        + bt_ref[...]
    )


def task_head(fc_out, w_task, b_task, n_classes):
    B, Fp = fc_out.shape
    Cp = w_task.shape[1]
    out = pl.pallas_call(
        _task_head_kernel,
        out_shape=jax.ShapeDtypeStruct((B, Cp), jnp.float32),
        compiler_params=pltpu.CompilerParams(vmem_limit_bytes=32 * 1024 * 1024),
    )(fc_out, w_task, b_task)
    return out[:, :n_classes]


# ---------------------------------------------------------------------------
# Module wrapper (mirrors BertBaseAttention.forward, minus the BERT backbone)
# ---------------------------------------------------------------------------
def bert_base_attention_forward(task_type, embs, prepped, dims):
    hidden = self_att(embs, prepped["w_s1"], prepped["b_s1"],
                      prepped["w_s2"], prepped["b_s2"])            # (B, Rp, H) bf16
    B = hidden.shape[0]
    flat = hidden.reshape(B, -1)                                   # contiguous, no copy/pad/cast
    fc_out = fc_layer(flat, prepped["w_fc"], prepped["b_fc"])      # (B, Fp) f32
    if task_type == "OCEMOTION":
        name = "ocemo"
    elif task_type == "OCNLI":
        name = "ocnli"
    elif task_type == "TNEWS":
        name = "tnews"
    else:
        raise ValueError("Unknown task type for " + task_type)
    return task_head(fc_out, prepped[f"w_{name}"], prepped[f"b_{name}"],
                     dims[f"C_{name}"])                            # (B, C)


# Pure-JAX f32 reference for correctness checking (un-padded weights).
def reference_forward(task_type, embs, params):
    a = jnp.tanh(embs @ params["w_s1"] + params["b_s1"][0]) @ params["w_s2"] + params["b_s2"][0]
    attn = jax.nn.softmax(jnp.transpose(a, (0, 2, 1)), axis=2)
    hidden = jnp.einsum("brs,bsh->brh", attn, embs)
    flat = hidden.reshape(hidden.shape[0], -1)
    fc = flat @ params["w_fc"] + params["b_fc"][0]
    if task_type == "OCEMOTION":
        return fc @ params["w_ocemo"] + params["b_ocemo"][0]
    if task_type == "OCNLI":
        return fc @ params["w_ocnli"] + params["b_ocnli"][0]
    return fc @ params["w_tnews"] + params["b_tnews"][0]


if __name__ == "__main__":
    # Small shapes consistent with the module structure
    # (original: H=768, DA=350, R=30, F=2000; scaled down for this synthetic run).
    B, S, H = 2, 8, 128
    DA, R, F = 128, 8, 256

    key = jax.random.PRNGKey(0)
    keys = jax.random.split(key, 12)

    def init(k, shape, scale=0.02):
        return scale * jax.random.normal(k, shape, dtype=jnp.float32)

    params = {
        "w_s1": init(keys[0], (H, DA)),     "b_s1": init(keys[1], (1, DA)),
        "w_s2": init(keys[2], (DA, R)),     "b_s2": init(keys[3], (1, R)),
        "w_fc": init(keys[4], (R * H, F)),  "b_fc": init(keys[5], (1, F)),
        "w_ocemo": init(keys[6], (F, 7)),   "b_ocemo": init(keys[7], (1, 7)),
        "w_ocnli": init(keys[8], (F, 3)),   "b_ocnli": init(keys[9], (1, 3)),
        "w_tnews": init(keys[10], (F, 15)), "b_tnews": init(keys[11], (1, 15)),
    }

    # One-time weight prep (pad + bf16) — hoisted out of the forward path.
    prepped, dims = prepare_params(params)
    prepped = jax.tree_util.tree_map(jax.block_until_ready, prepped)

    # Backbone is assumed to emit bf16 activations.
    embs = jax.random.normal(jax.random.PRNGKey(42), (B, S, H),
                             dtype=jnp.float32).astype(jnp.bfloat16)

    task = "TNEWS"
    out = bert_base_attention_forward(task, embs, prepped, dims)
    out = jax.block_until_ready(out)

    ref = reference_forward(task, embs.astype(jnp.float32), params)
    # bf16 streaming (embs / hidden / MXU operands) + approx reciprocal in the kernel
    # path -> looser tolerance vs the f32 reference.
    np.testing.assert_allclose(np.asarray(out), np.asarray(ref), rtol=3e-2, atol=1e-2)

    print("KERNEL_OK")
</pallas_src>

<mosaic_0001>
module attributes {stable_mosaic.version = 11 : i64} {
  func.func @_self_att_kernel(%arg0: i32, %arg1: memref<1x8x128xbf16, #tpu.memory_space<vmem>>, %arg2: memref<128x128xbf16, #tpu.memory_space<vmem>>, %arg3: memref<1x128xf32, #tpu.memory_space<vmem>>, %arg4: memref<128x8xbf16, #tpu.memory_space<vmem>>, %arg5: memref<1x8xf32, #tpu.memory_space<vmem>>, %arg6: memref<1x8x128xbf16, #tpu.memory_space<vmem>>) attributes {dimension_semantics = [#tpu.dimension_semantics<parallel>], iteration_bounds = array<i64: 2>, scalar_prefetch = 0 : i64, scratch_operands = 0 : i64, tpu.core_type = #tpu.core_type<tc>, window_params = [{transform_indices = @transform_0, window_bounds = array<i64: 1, 8, 128>}, {pipeline_mode = #tpu.pipeline_mode<synchronous>, transform_indices = @transform_1, window_bounds = array<i64: 128, 128>}, {pipeline_mode = #tpu.pipeline_mode<synchronous>, transform_indices = @transform_2, window_bounds = array<i64: 1, 128>}, {pipeline_mode = #tpu.pipeline_mode<synchronous>, transform_indices = @transform_3, window_bounds = array<i64: 128, 8>}, {pipeline_mode = #tpu.pipeline_mode<synchronous>, transform_indices = @transform_4, window_bounds = array<i64: 1, 8>}, {transform_indices = @transform_5, window_bounds = array<i64: 1, 8, 128>}]} {
    %c0 = arith.constant 0 : index
    %c0_0 = arith.constant 0 : index
    %c0_1 = arith.constant 0 : index
    %0 = vector.load %arg1[%c0, %c0_0, %c0_1] : memref<1x8x128xbf16, #tpu.memory_space<vmem>>, vector<1x8x128xbf16>
    %1 = vector.shape_cast %0 : vector<1x8x128xbf16> to vector<8x128xbf16>
    %c0_2 = arith.constant 0 : index
    %c0_3 = arith.constant 0 : index
    %2 = vector.load %arg2[%c0_2, %c0_3] : memref<128x128xbf16, #tpu.memory_space<vmem>>, vector<128x128xbf16>
    %cst = arith.constant dense<0.000000e+00> : vector<8x128xf32>
    %3 = tpu.matmul %1, %2, %cst {dimension_numbers = #tpu.dot_dimension_numbers<[1], [0], [0], [1], [0, 0, 1, 1], [], []>} : vector<8x128xbf16>, vector<128x128xbf16>, vector<8x128xf32> -> vector<8x128xf32>
    %c0_4 = arith.constant 0 : index
    %c0_5 = arith.constant 0 : index
    %4 = vector.load %arg3[%c0_4, %c0_5] : memref<1x128xf32, #tpu.memory_space<vmem>>, vector<1x128xf32>
    %5 = vector.broadcast %4 : vector<1x128xf32> to vector<8x128xf32>
    %6 = arith.addf %3, %5 : vector<8x128xf32>
    %7 = math.tanh %6 : vector<8x128xf32>
    %8 = arith.truncf %7 : vector<8x128xf32> to vector<8x128xbf16>
    %c0_6 = arith.constant 0 : index
    %c0_7 = arith.constant 0 : index
    %9 = vector.load %arg4[%c0_6, %c0_7] : memref<128x8xbf16, #tpu.memory_space<vmem>>, vector<128x8xbf16>
    %cst_8 = arith.constant dense<0.000000e+00> : vector<8x8xf32>
    %10 = tpu.matmul %8, %9, %cst_8 {dimension_numbers = #tpu.dot_dimension_numbers<[1], [0], [0], [1], [0, 0, 1, 1], [], []>} : vector<8x128xbf16>, vector<128x8xbf16>, vector<8x8xf32> -> vector<8x8xf32>
    %c0_9 = arith.constant 0 : index
    %c0_10 = arith.constant 0 : index
    %11 = vector.load %arg5[%c0_9, %c0_10] : memref<1x8xf32, #tpu.memory_space<vmem>>, vector<1x8xf32>
    %12 = vector.broadcast %11 : vector<1x8xf32> to vector<8x8xf32>
    %13 = arith.addf %10, %12 : vector<8x8xf32>
    %14 = vector.shape_cast %13 : vector<8x8xf32> to vector<1x8x8xf32>
    %cst_11 = arith.constant dense<0xFF800000> : vector<1x8xf32>
    %15 = vector.multi_reduction <maximumf>, %14, %cst_11 [1] : vector<1x8x8xf32> to vector<1x8xf32>
    %16 = vector.shape_cast %15 : vector<1x8xf32> to vector<1x1x8xf32>
    %17 = vector.broadcast %16 : vector<1x1x8xf32> to vector<1x8x8xf32>
    %18 = arith.subf %14, %17 : vector<1x8x8xf32>
    %19 = math.exp %18 : vector<1x8x8xf32>
    %cst_12 = arith.constant dense<0.000000e+00> : vector<1x8xf32>
    %20 = vector.multi_reduction <add>, %19, %cst_12 [1] : vector<1x8x8xf32> to vector<1x8xf32>
    %21 = vector.shape_cast %20 : vector<1x8xf32> to vector<1x1x8xf32>
    %22 = tpu.reciprocal %21 {approx = true} : vector<1x1x8xf32> -> vector<1x1x8xf32>
    %23 = vector.broadcast %22 : vector<1x1x8xf32> to vector<1x8x8xf32>
    %24 = arith.mulf %19, %23 : vector<1x8x8xf32>
    %25 = arith.truncf %24 : vector<1x8x8xf32> to vector<1x8x8xbf16>
    %cst_13 = arith.constant dense<0.000000e+00> : vector<1x8x128xf32>
    %26 = tpu.matmul %25, %0, %cst_13 {dimension_numbers = #tpu.dot_dimension_numbers<[1], [1], [2], [2], [0, 0, 0, 2, 1, 2], [0], [0]>} : vector<1x8x8xbf16>, vector<1x8x128xbf16>, vector<1x8x128xf32> -> vector<1x8x128xf32>
    %27 = arith.truncf %26 : vector<1x8x128xf32> to vector<1x8x128xbf16>
    %c0_14 = arith.constant 0 : index
    %c0_15 = arith.constant 0 : index
    %c0_16 = arith.constant 0 : index
    %28 = vector.load %arg6[%c0_14, %c0_15, %c0_16] : memref<1x8x128xbf16, #tpu.memory_space<vmem>>, vector<1x8x128xbf16>
    tpu.vector_store %arg6[%c0_14, %c0_15, %c0_16], %27 {strides = array<i32>} : memref<1x8x128xbf16, #tpu.memory_space<vmem>>, vector<1x8x128xbf16>,
    return
  }
  func.func @transform_0(%arg0: i32) -> (i32, i32, i32) {
    %c0_i32 = arith.constant 0 : i32
    %c0_i32_0 = arith.constant 0 : i32
    %c0_i32_1 = arith.constant 0 : i32
    return %arg0, %c0_i32, %c0_i32_0 : i32, i32, i32
  }
  func.func @transform_1(%arg0: i32) -> (i32, i32) {
    %c0_i32 = arith.constant 0 : i32
    %c0_i32_0 = arith.constant 0 : i32
    %c0_i32_1 = arith.constant 0 : i32
    return %c0_i32, %c0_i32_0 : i32, i32
  }
  func.func @transform_2(%arg0: i32) -> (i32, i32) {
    %c0_i32 = arith.constant 0 : i32
    %c0_i32_0 = arith.constant 0 : i32
    %c0_i32_1 = arith.constant 0 : i32
    return %c0_i32, %c0_i32_0 : i32, i32
  }
  func.func @transform_3(%arg0: i32) -> (i32, i32) {
    %c0_i32 = arith.constant 0 : i32
    %c0_i32_0 = arith.constant 0 : i32
    %c0_i32_1 = arith.constant 0 : i32
    return %c0_i32, %c0_i32_0 : i32, i32
  }
  func.func @transform_4(%arg0: i32) -> (i32, i32) {
    %c0_i32 = arith.constant 0 : i32
    %c0_i32_0 = arith.constant 0 : i32
    %c0_i32_1 = arith.constant 0 : i32
    return %c0_i32, %c0_i32_0 : i32, i32
  }
  func.func @transform_5(%arg0: i32) -> (i32, i32, i32) {
    %c0_i32 = arith.constant 0 : i32
    %c0_i32_0 = arith.constant 0 : i32
    %c0_i32_1 = arith.constant 0 : i32
    return %arg0, %c0_i32, %c0_i32_0 : i32, i32, i32
  }
}

</mosaic_0001>

<bundles_post_ra>
// kernel: tpu_custom_call.1
= control target key start
LH: loop header
LB: loop body
LE: loop exit
PB: predicated region body
PF: predicated region fallthrough
CT: control target
= control target key end

     0   :  { %10 = vsyncpa [#allocation3], 0  ;;  %s1164_s0 = inlined_call_operand.hbm [shape: bf16[2,8,128], index: 0, kind: input, shape index: {}]   ;;  %s1165_s1 = inlined_call_operand.vmem [shape: bf16[128,128], index: 1, kind: input, shape index: {}]   ;;  %s1166_s2 = inlined_call_operand.vmem [shape: f32[1,128], index: 2, kind: input, shape index: {}]   ;;  %s1167_s3 = inlined_call_operand.vmem [shape: bf16[128,8], index: 3, kind: input, shape index: {}]   ;;  %s1168_s4 = inlined_call_operand.vmem [shape: f32[1,8], index: 4, kind: input, shape index: {}]   ;;  %s1169_s5 = inlined_call_operand.hbm [shape: bf16[2,8,128], index: 5, kind: output, shape index: {}]  }
   0x1   :  { %12 = vsyncpa [#allocation3 + $0x1], 0 }
   0x2   :  { %13 = vsyncpa [#allocation4], 0 }
   0x3   :  { %15 = vsyncpa [#allocation4 + $0x1], 0  ;;  %s936_s18 = smov 0   ;;  %s938_s19 = smov 0  }
   0x4   :  { %s940_s20 = smov 0   ;;  %s942_s21 = smov 0  }
   0x5 LB: > { %s957_s22 = sadd.s32 4294967295, %s900_s21   ;;  %s636_s23 = sadd.s32 4294967294, %s900_s21   ;;  %s900_s21 = sphi %s942_s21, %s1184_s21   ;;  %s896_s20 = sphi %s940_s20, %s1183_s20   ;;  %s892_s19 = sphi %s938_s19, %s1182_s19   ;;  %s888_s18 = sphi %s936_s18, %s1181_s18  }
   0x6   : > { %s961_s24 = sadd.s32 1, %s900_s21   ;;  %s28_s25 = sadd.s32 1, %s896_s20 }
   0x7   : > { %s25_s26 = ssub.s32 %s900_s21, %s961_s24  ;;  %p35_p0 = scmp.ne.s32.totalorder %s896_s20, %s892_s19 }
   0x8   : > { %p26_p1 = scmp.eq.s32.totalorder %s25_s26, 0  ;;  %p36_p2 = scmp.eq.s32.totalorder %s900_s21, 0 }
   0x9   : > { %p41_p3 = scmp.ne.s32.totalorder %s892_s19, %s888_s18  ;;  %p42_p4 = scmp.eq.s32.totalorder %s957_s22, 0 }
   0xa   : > { %s973_s27 = scalar_select %p26_p1, %s896_s20, %s28_s25  }
   0xb   : > { %p975_p5 = por %p36_p2, %p35_p0  ;;  %p979_p6 = por %p42_p4, %p41_p3 }
   0xc   : > { %p149_p7 = scmp.eq.s32.totalorder %s957_s22, 1  ;;  %p155_p8 = scmp.eq.s32.totalorder %s636_s23, 1 }
   0xd   : > { %p745_p10 = scmp.lt.s32.totalorder %s900_s21, 2  ;;  %s187_s7 = sand.u32 1, %s896_s20  }
   0xe   : > { %p986_p11 = por %p149_p7, %p35_p0  ;;  %p990_p12 = por %p155_p8, %p41_p3 }
   0xf   : > { %s640_s8 = sshll.u32 %s900_s21, 6  ;;  %s639_s9 = sshll.u32 %s187_s7, 2 }
  0x10   : > { %s1173_s30 = scalar_select %p986_p11, 1, 0 }
  0x11   : > { %s1174_s6 = scalar_select %p990_p12, 1, 0 }
  0x12   : > { %s999_s12 = scalar_lea.hbm %s1164_s0, %s640_s8  ;;  %s191_s13 = scalar_lea.vmem [#allocation2], %s639_s9 }
  0x13   : > { %s198_s14 = sshll.u32 %s191_s13, 4  ;;  %p1003_p13 = pnand %p745_p10, %p975_p5  ;;  %s1007_s14 = int_to_ptr.vmem [resolvable:$true] %s198_s14 }
  0x14   : > { %s188_s16 = scalar_lea.sflag [#allocation3], %s187_s7  ;;  %s804_s17 = scalar_lea.hbm %s999_s12, 64 }
  0x15   : > { %p805_p2 = scmp.ne.s32.totalorder %s999_s12, %s804_s17  ;;  %p806_p3 = pneg %p1003_p13 }
  0x16   : > { %s809_s26 = scalar_lea.hbm %s1164_s0, 128  ;;  %p810_p5 = scmp.lt.u32.totalorder %s999_s12, %s1164_s0 }
  0x17   : > { %p807_p4 = pnand %p806_p3, %p805_p2  ;;  %p811_p8 = scmp.lt.u32.totalorder %s809_s26, %s804_s17 }
  0x18   : > { %p813_p9 = scmp.lt.u32.totalorder %s804_s17, %s999_s12 }
  0x19   : > { %p808_p7 = pneg %p807_p4  ;;  %p812_p10 = por %p811_p8, %p810_p5 }
  0x1b   : > { %p814_p0 = por %p813_p9, %p812_p10 }
  0x1d   : > { %p815_p1 = pnand %p814_p0, %p808_p7 }
  0x1f   : > { %818 = shalt.err (!%p815_p1)
}
  0x20   : > { %s819_s7 = scalar_lea.vmem %s1007_s14, 64  ;;  %s902_s9 = smov [#allocation2]  }
  0x21   : > { %p820_p2 = scmp.ne.s32.totalorder %s1007_s14, %s819_s7  ;;  %s824_s10 = sshll.u32 %s902_s9, 4  ;;  %s825_s10 = int_to_ptr.vmem [resolvable:$false] %s824_s10 }
  0x22   : > { %s826_s11 = scalar_lea.vmem %s825_s10, 128  ;;  %p827_p11 = scmp.lt.s32.totalorder %s1007_s14, %s825_s10 }
  0x23   : > { %p822_p4 = pnand %p820_p2, %p806_p3  ;;  %p828_p5 = scmp.lt.s32.totalorder %s826_s11, %s819_s7 }
  0x25   : > { %p823_p12 = pneg %p822_p4  ;;  %p829_p8 = por %p828_p5, %p827_p11 }
  0x27   : > { %p830_p9 = pnand %p829_p8, %p823_p12 }
  0x29   : > { %833 = shalt.err (!%p830_p9)
}
  0x2a   : > { %740 = dma.hbm_to_vmem [thread:$0]  (!%p1003_p13), %s999_s12, 64, %s1007_s14, %s188_s16  }
  0x2b   : > { %p1176_p0 = scmp.lt.s32.totalorder %s900_s21, 3  ;;  %p1177_p1 = scmp.ge.s32.totalorder %s900_s21, 1 }
  0x2d   : > { %p204_p3 = pnand %p1177_p1, %p1176_p0 }
  0x2e   : > { %s1041_s13 = sand.u32 (!%p204_p3), 1, %s892_s19  }
  0x2f   : > { %207 = sbr.rel (%p204_p3) target bundleno = 917 (0x395), region = 40  ;;  %s642_s17 = sshll.u32 (!%p204_p3), %s1041_s13, 2 }
  0x30   : > { %s210_s23 = scalar_lea.sflag (!%p204_p3), [#allocation3], %s1041_s13  ;;  %s1047_s15 = scalar_lea.vmem (!%p204_p3), [#allocation2], %s642_s17 }
  0x36   : > { %879 = dma.done.wait (%p979_p6), %s210_s23, 64  }
  0x37   : > { %881 = vsyncadd (%p979_p6), %s210_s23, 4294967232  ;;  %v903_v0 = vmov 0.0   ;;  %vm904_vm0 = vmmov 0   ;;  %v782_v1 = vld [vmem:[%s1165_s1] sm:$0xff]   ;;  %v783_v2 = vld [vmem:[%s1165_s1 + $0x8] sm:$0xff]   ;;  %vm506_vm1 = vcmask 1043456  }
  0x38   : > { %687 = vmatprep.subr.bf16.mxu0 %v903_v0  ;;  %703 = vmatprep.mubr.msk.bf16.mxu0 %vm904_vm0, %v903_v0  ;;  %v784_v3 = vld [vmem:[%s1165_s1 + $0x10] sm:$0xff]   ;;  %v790_v4 = vld [vmem:[%s1167_s3] sm:$0xff]   ;;  %v785_v5 = vld [vmem:[%s1165_s1 + $0x18] sm:$0xff]   ;;  %vm466_vm2 = vcmask 64512   ;;  %s664_s9 = sshll.u32 %s957_s22, 6  ;;  %s239_s10 = scalar_lea.vmem [#allocation5], %s642_s17 }
  0x39   : > { %707 = vmatprep.subr.bf16.mxu1 %v903_v0  ;;  %723 = vmatprep.mubr.msk.bf16.mxu1 %vm904_vm0, %v903_v0  ;;  %v791_v6 = vld [vmem:[%s1167_s3 + $0x8] sm:$0xff]   ;;  %v786_v7 = vld [vmem:[%s1165_s1 + $0x20] sm:$0xff]   ;;  %v792_v8 = vld [vmem:[%s1167_s3 + $0x10] sm:$0xff]   ;;  %s566_s11 = sshll.u32 %s239_s10, 4  ;;  %s1120_s14 = scalar_lea.hbm %s1169_s5, %s664_s9  ;;  %s1122_s11 = int_to_ptr.vmem [resolvable:$true] %s566_s11 }
  0x3a   : > { %688 = vmatpush3.bf16.msra.mxu0 %v782_v1  ;;  %708 = vmatpush3.bf16.msra.mxu1 %v790_v4  ;;  %v787_v9 = vld [vmem:[%s1165_s1 + $0x28] sm:$0xff]   ;;  %v793_v10 = vld [vmem:[%s1167_s3 + $0x18] sm:$0xff]   ;;  %v788_v11 = vld [vmem:[%s1165_s1 + $0x30] sm:$0xff]   ;;  %s553_s22 = scalar_lea.sflag [#allocation4], %s1041_s13  ;;  %s834_s16 = scalar_lea.vmem %s1122_s11, 64 }
  0x3b   : > { %689 = vmatprep.subr.bf16.mxu0 %v903_v0  ;;  %709 = vmatprep.subr.bf16.mxu1 %v903_v0  ;;  %v789_v12 = vld [vmem:[%s1165_s1 + $0x38] sm:$0xff]   ;;  %v241_v13 = vld [vmem:[%s1047_s15] sm:$0xf]  ;;  %v795_v16 = vld [vmem:[%s1167_s3 + $0x28] sm:$0xff]   ;;  %p835_p6 = scmp.ne.s32.totalorder %s1122_s11, %s834_s16  ;;  %p1178_p11 = scmp.ne.s32.totalorder %s1173_s30, 0 }
  0x3c   : > { %v508_v14 = vsel %vm506_vm1, %v241_v13, 0  ;;  %v794_v15 = vld [vmem:[%s1167_s3 + $0x20] sm:$0xff]   ;;  %v796_v17 = vld [vmem:[%s1167_s3 + $0x30] sm:$0xff]   ;;  %v797_v18 = vld [vmem:[%s1167_s3 + $0x38] sm:$0xff]   ;;  %s905_s17 = smov [#allocation5]  }
  0x3d   : > { %v644_v19 = vld [vmem:[%s1166_s2] ss:$0 sm:$0xff]  ;;  %p836_p12 = pnand %p835_p6, %p1178_p11  ;;  %s838_s15 = sshll.u32 %s905_s17, 4  ;;  %s839_s15 = int_to_ptr.vmem [resolvable:$false] %s838_s15 }
  0x3e   : > { %690 = vmatpush3.bf16.msra.mxu0 %v783_v2  ;;  %710 = vmatpush3.bf16.msra.mxu1 %v791_v6  ;;  %v653_v27 = vld [vmem:[%s1168_s4] ss:$0 sm:$0xff]  ;;  %s840_s25 = scalar_lea.vmem %s839_s15, 128  ;;  %p841_p7 = scmp.lt.s32.totalorder %s1122_s11, %s839_s15 }
  0x3f   : > { %691 = vmatprep.subr.bf16.mxu0 %v903_v0  ;;  %711 = vmatprep.subr.bf16.mxu1 %v903_v0  ;;  %p837_p13 = pneg %p836_p12  ;;  %p842_p10 = scmp.lt.s32.totalorder %s840_s25, %s834_s16 }
  0x41   : > { %p843_p2 = por %p842_p10, %p841_p7 }
  0x42   : > { %692 = vmatpush3.bf16.msra.mxu0 %v784_v3  ;;  %712 = vmatpush3.bf16.msra.mxu1 %v792_v8 }
  0x43   : > { %693 = vmatprep.subr.bf16.mxu0 %v903_v0  ;;  %713 = vmatprep.subr.bf16.mxu1 %v903_v0  ;;  %p844_p4 = pnand %p843_p2, %p837_p13 }
  0x46   : > { %694 = vmatpush3.bf16.msra.mxu0 %v785_v5  ;;  %714 = vmatpush3.bf16.msra.mxu1 %v793_v10 }
  0x47   : > { %695 = vmatprep.subr.bf16.mxu0 %v903_v0  ;;  %715 = vmatprep.subr.bf16.mxu1 %v903_v0 }
  0x4a   : > { %696 = vmatpush3.bf16.msra.mxu0 %v786_v7  ;;  %716 = vmatpush3.bf16.msra.mxu1 %v794_v15 }
  0x4b   : > { %697 = vmatprep.subr.bf16.mxu0 %v903_v0  ;;  %717 = vmatprep.subr.bf16.mxu1 %v903_v0 }
  0x4e   : > { %698 = vmatpush3.bf16.msra.mxu0 %v787_v9  ;;  %718 = vmatpush3.bf16.msra.mxu1 %v795_v16 }
  0x4f   : > { %699 = vmatprep.subr.bf16.mxu0 %v903_v0  ;;  %719 = vmatprep.subr.bf16.mxu1 %v903_v0 }
  0x52   : > { %700 = vmatpush3.bf16.msra.mxu0 %v788_v11  ;;  %720 = vmatpush3.bf16.msra.mxu1 %v796_v17 }
  0x53   : > { %701 = vmatprep.subr.bf16.mxu0 %v903_v0  ;;  %721 = vmatprep.subr.bf16.mxu1 %v903_v0 }
  0x56   : > { %702 = vmatpush3.bf16.msra.mxu0 %v789_v12  ;;  %722 = vmatpush3.bf16.msra.mxu1 %v797_v18 }
  0x57   : > { %727 = vmatprep.subr.bf16.mxu0 %v903_v0 }
  0x59   : > { %704 = vmatmul.mubr.bf16.vlgmr.msra.gmra.mrb[0].mxu0 %v241_v13 }
  0x5a   : > { %728 = vmatpush3.bf16.msra.mxu0 %v508_v14  ;;  %729 = vmatprep.mubr.msk.bf16.mxu0 %vm904_vm0, %v903_v0 }
 0x12c   : > { %v347_v20 = vpop.f32.mrb[0].mxu0 }
 0x12d   : > { %v348_v21 = vadd.f32 %v644_v19, %v347_v20  ;;  %v705_v22 = vpop.f32.mrb[1].mxu0 }
 0x12e   : > { %v350_v23 = vpop.f32.mrb[2].mxu0 }
 0x12f   : > { %798 = vtanh.f32 %v348_v21  ;;  %v706_v24 = vpop.f32.mrb[3].mxu0 }
 0x139   : > { %v799_v25 = vpop.eup %798 }
 0x13a   : > { %v354_v26 = vpack.c.bf16 %v799_v25, %v799_v25 }
 0x13c   : > { %724 = vmatmul.mubr.bf16.vlgmr.msra.gmra.mrb[0].mxu1 %v354_v26 }
 0x20f   : > { %v460_v28 = vpop.f32.mrb[0].mxu1 }
 0x210   : > { %v461_v29 = vadd.f32 %v653_v27, %v460_v28  ;;  %v725_v30 = vpop.f32.mrb[1].mxu1 }
 0x211   : > { %v463_v31 = vpop.f32.mrb[2].mxu1 }
 0x212   : > { %v467_v32 = vsel %vm466_vm2, %v461_v29, -inf  ;;  %v726_v33 = vpop.f32.mrb[3].mxu1 }
 0x213   : > { %v468_v34 = vrot.slane %v467_v32, 4 }
 0x215   : > { %v469_v35 = vmax.f32 %v467_v32, %v468_v34 }
 0x217   : > { %v470_v36 = vrot.slane %v469_v35, 2 }
 0x219   : > { %v471_v37 = vmax.f32 %v469_v35, %v470_v36 }
 0x21b   : > { %v472_v38 = vrot.slane %v471_v37, 1 }
 0x21d   : > { %v473_v39 = vmax.f32 %v471_v37, %v472_v38 }
 0x21f   : > { %v474_v40 = vsub.f32 %v461_v29, %v473_v39 }
 0x221   : > { %v475_v41 = vmul.f32 1.442695, %v474_v40 }
 0x223   : > { %800 = vpow2.f32 %v475_v41 }
 0x22d   : > { %v801_v42 = vpop.eup %800 }
 0x22e   : > { %v477_v43 = vsel %vm466_vm2, %v801_v42, 0.0 }
 0x22f   : > { %v478_v44 = vrot.slane %v477_v43, 4 }
 0x231   : > { %v479_v45 = vadd.f32 %v478_v44, %v477_v43 }
 0x233   : > { %v480_v46 = vrot.slane %v479_v45, 2 }
 0x235   : > { %v481_v47 = vadd.f32 %v480_v46, %v479_v45 }
 0x237   : > { %v482_v48 = vrot.slane %v481_v47, 1 }
 0x239   : > { %v483_v49 = vadd.f32 %v482_v48, %v481_v47 }
 0x23b   : > { %802 = vrcp.f32 %v483_v49 }
 0x245   : > { %v803_v50 = vpop.eup %802 }
 0x246   : > { %v485_v51 = vmul.f32 %v803_v50, %v801_v42 }
 0x248   : > { %v486_v52 = vpack.c.bf16 %v485_v51, %v485_v51 }
 0x24a   : > { %487 = vxpose.xlu0.c.b16.start.end [1/1] (short) (narrow) %v486_v52, 16 }
 0x2b0   : > { %v495_v53 = vpop.trf.xlu0 }
 0x2b1   : > { %730 = vmatmul.mubr.msk.bf16.vlgmr.msra.gmra.mrb[4].mxu0 %vm466_vm2, %v495_v53 }
 0x384   : > { %v544_v54 = vpop.f32.mrb[4].mxu0 }
 0x385   : > { %v550_v55 = vpack.c.bf16 %v544_v54, %v544_v54  ;;  %v731_v56 = vpop.f32.mrb[5].mxu0 }
 0x386   : > { %v547_v57 = vpop.f32.mrb[6].mxu0 }
 0x387   : > { %551 = vst [vmem:[%s239_s10] sm:$0xf] %v550_v55  ;;  %v732_v58 = vpop.f32.mrb[7].mxu0 }
 0x388   : > { %847 = shalt.err (!%p844_p4)
}
 0x389   : > { %s848_s13 = scalar_lea.hbm %s1120_s14, 64  ;;  %s852_s28 = scalar_lea.hbm %s1169_s5, 128 }
 0x38a   : > { %p849_p5 = scmp.ne.s32.totalorder %s1120_s14, %s848_s13  ;;  %p853_p0 = scmp.lt.u32.totalorder %s1120_s14, %s1169_s5 }
 0x38b   : > { %p854_p1 = scmp.lt.u32.totalorder %s852_s28, %s848_s13  ;;  %p856_p6 = scmp.lt.u32.totalorder %s848_s13, %s1120_s14 }
 0x38c   : > { %p850_p8 = pnand %p849_p5, %p1178_p11 }
 0x38d   : > { %p855_p3 = por %p854_p1, %p853_p0 }
 0x38e   : > { %p851_p9 = pneg %p850_p8 }
 0x38f   : > { %p857_p12 = por %p856_p6, %p855_p3 }
 0x391   : > { %p858_p13 = pnand %p857_p12, %p851_p9 }
 0x393   : > { %861 = shalt.err (!%p858_p13)
}
 0x394   : > { %735 = dma.vmem_to_hbm [thread:$0]  (%p1178_p11), %s1122_s11, 64, %s1120_s14, %s553_s22  }
 0x395 PF: > { %s578_s9 = sand.u32 1, %s888_s18   ;;  %p1179_p7 = scmp.ne.s32.totalorder %s1174_s6, 0 }
 0x396   : > { %p1180_p10 = scmp.ge.s32.totalorder %s900_s21, 2  ;;  %s579_s10 = scalar_lea.sflag [#allocation4], %s578_s9 }
 0x398   : > { %p742_p2 = pnand %p1180_p10, %p1179_p7 }
 0x39a   : > { %883 = dma.done.wait (!%p742_p2), %s579_s10, 64  }
 0x39b   : > { %885 = vsyncadd (!%p742_p2), %s579_s10, 4294967232  ;;  %p18_p4 = scmp.ge.s32.totalorder %s961_s24, 4   ;;  %s1181_s18 = smov %s892_s19 }
 0x39c   : > { %s1182_s19 = smov %s896_s20  ;;  %s1183_s20 = smov %s973_s27 }
 0x39d   : > { %s1184_s21 = smov %s961_s24  ;;  %20 = sbr.rel (!%p18_p4) target bundleno = 5 (0x5), region = 85 }
 0x3a4   :  { %584 = vsyncpa [#allocation3], 1 }
 0x3a5   :  { %586 = vsyncpa [#allocation3 + $0x1], 1 }
 0x3a6   :  { %587 = vsyncpa [#allocation4], 1 }
 0x3a7   :  { %589 = vsyncpa [#allocation4 + $0x1], 1 }

</bundles_post_ra>
